<compile_context>
chip_gen: v7x
topology: tpu7x:2x2x1
jax: 0.10.0
libtpu: 0.0.40
codegen_flags: <defaults>
</compile_context>

<pallas_src>
import functools

import numpy as np
import jax
import jax.numpy as jnp
from jax.experimental import pallas as pl
from jax.experimental.pallas import tpu as pltpu


def _choose_hw_tile(hw, bytes_per_hw_elem, target_bytes=2 * 1024 * 1024):
    """Largest HW tile that is a multiple of 128, divides HW, and keeps one
    (leading, C, HW_tile) block under ~target_bytes.  Falls back to the full
    extent (always a legal block dim) when HW is not 128-aligned."""
    if hw % 128 != 0:
        return hw
    max_tile = max(128, (target_bytes // max(bytes_per_hw_elem, 1)) // 128 * 128)
    best = 128
    for t in range(128, min(hw, max_tile) + 1, 128):
        if hw % t == 0:
            best = t
    return best


# ---------------- Pass 1: tiled global avg/max pooling ----------------

def _pool_kernel(x_ref, avg_ref, max_ref, sum_acc, max_acc, *, inv_hw):
    # x_ref: (1, C, hw_tile) f32 ; avg_ref/max_ref: (1, C, 1)
    # sum_acc/max_acc: (1, C) f32 VMEM scratch, persistent across grid steps.
    k = pl.program_id(1)

    @pl.when(k == 0)
    def _():
        sum_acc[...] = jnp.zeros_like(sum_acc)
        max_acc[...] = jnp.full_like(max_acc, -jnp.inf)

    x = x_ref[...]
    sum_acc[...] += jnp.sum(x, axis=-1)
    max_acc[...] = jnp.maximum(max_acc[...], jnp.max(x, axis=-1))

    @pl.when(k == pl.num_programs(1) - 1)
    def _():
        avg_ref[...] = (sum_acc[...] * inv_hw)[:, :, None]
        max_ref[...] = max_acc[...][:, :, None]


# ---------------- Pass 2: tiled broadcast scaling ----------------

def _scale_kernel(x_ref, scale_ref, o_ref):
    # x_ref/o_ref: (1, C, hw_tile); scale_ref: (1, C, 1) -> lane broadcast.
    o_ref[...] = x_ref[...] * scale_ref[...]


def channel_gate(x_nchw, w1, b1, w2, b2):
    """x_nchw: (B, C, H, W) float32.  Weights stored transposed to (in, out)."""
    B, C, H, W = x_nchw.shape
    HW = H * W
    x_flat = x_nchw.reshape(B, C, HW)

    hw_tile = _choose_hw_tile(HW, B * C * 4)
    n_hw = HW // hw_tile

    # --- pass 1: pooled mean and max over the spatial axis ---
    avg, mx = pl.pallas_call(
        functools.partial(_pool_kernel, inv_hw=1.0 / HW),
        out_shape=(jax.ShapeDtypeStruct((B, C, 1), jnp.float32),
                   jax.ShapeDtypeStruct((B, C, 1), jnp.float32)),
        grid_spec=pltpu.PrefetchScalarGridSpec(
            num_scalar_prefetch=0,
            grid=(B, n_hw),
            in_specs=[pl.BlockSpec((1, C, hw_tile), lambda b, k: (b, 0, k))],
            out_specs=[pl.BlockSpec((1, C, 1), lambda b, k: (b, 0, 0)),
                       pl.BlockSpec((1, C, 1), lambda b, k: (b, 0, 0))],
            scratch_shapes=[pltpu.VMEM((1, C), jnp.float32),
                            pltpu.VMEM((1, C), jnp.float32)]),
        compiler_params=pltpu.CompilerParams(
            dimension_semantics=("parallel", "arbitrary")),
    )(x_flat)

    # --- tiny shared-weight MLP + sigmoid: plain XLA, off the streamed path ---
    avg2, mx2 = avg[:, :, 0], mx[:, :, 0]          # (B, C)

    def mlp(p):
        h = jnp.maximum(p @ w1 + b1, 0.0)
        return h @ w2 + b2

    scale = jax.nn.sigmoid(mlp(avg2) + mlp(mx2))   # (B, C)
    scale = scale[:, :, None].astype(jnp.float32)  # (B, C, 1)

    # --- pass 2: elementwise broadcast-scale, fully parallel grid ---
    # (If the caller no longer needs x, input_output_aliases={0: 0} would avoid
    #  a second x-sized HBM allocation; not enabled here to keep x intact.)
    out_flat = pl.pallas_call(
        _scale_kernel,
        out_shape=jax.ShapeDtypeStruct((B, C, HW), jnp.float32),
        grid_spec=pltpu.PrefetchScalarGridSpec(
            num_scalar_prefetch=0,
            grid=(B, n_hw),
            in_specs=[pl.BlockSpec((1, C, hw_tile), lambda b, k: (b, 0, k)),
                      pl.BlockSpec((1, C, 1), lambda b, k: (b, 0, 0))],
            out_specs=pl.BlockSpec((1, C, hw_tile), lambda b, k: (b, 0, k))),
        compiler_params=pltpu.CompilerParams(
            dimension_semantics=("parallel", "parallel")),
    )(x_flat, scale)

    return out_flat.reshape(B, C, H, W)


def channel_gate_ref(x, w1, b1, w2, b2):
    """Pure-JAX reference mirroring the PyTorch forward."""
    B, C, H, W = x.shape
    avg = x.reshape(B, C, -1).mean(-1)
    mx = x.reshape(B, C, -1).max(-1)

    def mlp(p):
        h = jnp.maximum(p @ w1 + b1, 0.0)
        return h @ w2 + b2

    scale = jax.nn.sigmoid(mlp(avg) + mlp(mx))
    return x * scale[:, :, None, None]


if __name__ == "__main__":
    # Module config: gate_channels=64, reduction_ratio=16 -> hidden = 4.
    B, C, H, W = 2, 64, 16, 16
    Cr = C // 16

    key = jax.random.PRNGKey(0)
    kx, kw1, kb1, kw2, kb2 = jax.random.split(key, 5)

    x = jax.random.normal(kx, (B, C, H, W), dtype=jnp.float32)

    # nn.Linear weight shape is (out, in); store the transposed (in, out) form.
    w1 = (jax.random.normal(kw1, (Cr, C), dtype=jnp.float32) * 0.1).T  # (C, Cr)
    b1 = (jax.random.normal(kb1, (Cr,), dtype=jnp.float32) * 0.1).reshape(1, Cr)
    w2 = (jax.random.normal(kw2, (C, Cr), dtype=jnp.float32) * 0.1).T  # (Cr, C)
    b2 = (jax.random.normal(kb2, (C,), dtype=jnp.float32) * 0.1).reshape(1, C)

    fn = jax.jit(channel_gate)
    out = jax.block_until_ready(fn(x, w1, b1, w2, b2))

    ref = channel_gate_ref(x, w1, b1, w2, b2)
    np.testing.assert_allclose(np.asarray(out), np.asarray(ref), rtol=1e-5, atol=1e-5)

    print("KERNEL_OK")
</pallas_src>

<mosaic_0001>
module attributes {stable_mosaic.version = 11 : i64} {
  func.func @_pool_kernel(%arg0: i32, %arg1: i32, %arg2: memref<1x64x256xf32, #tpu.memory_space<vmem>>, %arg3: memref<1x64x1xf32, #tpu.memory_space<vmem>>, %arg4: memref<1x64x1xf32, #tpu.memory_space<vmem>>, %arg5: memref<1x64xf32, #tpu.memory_space<vmem>>, %arg6: memref<1x64xf32, #tpu.memory_space<vmem>>) attributes {dimension_semantics = [#tpu.dimension_semantics<parallel>, #tpu.dimension_semantics<arbitrary>], iteration_bounds = array<i64: 2, 1>, scalar_prefetch = 0 : i64, scratch_operands = 2 : i64, tpu.core_type = #tpu.core_type<tc>, window_params = [{transform_indices = @transform_0, window_bounds = array<i64: 1, 64, 256>}, {transform_indices = @transform_1, window_bounds = array<i64: 1, 64, 1>}, {transform_indices = @transform_2, window_bounds = array<i64: 1, 64, 1>}]} {
    %c0_i32 = arith.constant 0 : i32
    %0 = arith.cmpi eq, %arg1, %c0_i32 : i32
    %1 = arith.extui %0 : i1 to i32
    %c0_i32_0 = arith.constant 0 : i32
    %2 = arith.cmpi ne, %1, %c0_i32_0 : i32
    scf.if %2 {
      %cst_14 = arith.constant 0.000000e+00 : f32
      %15 = vector.broadcast %cst_14 : f32 to vector<1x64xf32>
      %c0_15 = arith.constant 0 : index
      %c0_16 = arith.constant 0 : index
      %16 = vector.load %arg5[%c0_15, %c0_16] : memref<1x64xf32, #tpu.memory_space<vmem>>, vector<1x64xf32>
      tpu.vector_store %arg5[%c0_15, %c0_16], %15 {strides = array<i32>} : memref<1x64xf32, #tpu.memory_space<vmem>>, vector<1x64xf32>,
      %cst_17 = arith.constant 0xFF800000 : f32
      %17 = vector.broadcast %cst_17 : f32 to vector<1x64xf32>
      %c0_18 = arith.constant 0 : index
      %c0_19 = arith.constant 0 : index
      %18 = vector.load %arg6[%c0_18, %c0_19] : memref<1x64xf32, #tpu.memory_space<vmem>>, vector<1x64xf32>
      tpu.vector_store %arg6[%c0_18, %c0_19], %17 {strides = array<i32>} : memref<1x64xf32, #tpu.memory_space<vmem>>, vector<1x64xf32>,
    } else {
    }
    %c0 = arith.constant 0 : index
    %c0_1 = arith.constant 0 : index
    %c0_2 = arith.constant 0 : index
    %3 = vector.load %arg2[%c0, %c0_1, %c0_2] : memref<1x64x256xf32, #tpu.memory_space<vmem>>, vector<1x64x256xf32>
    %c0_3 = arith.constant 0 : index
    %c0_4 = arith.constant 0 : index
    %4 = vector.load %arg5[%c0_3, %c0_4] : memref<1x64xf32, #tpu.memory_space<vmem>>, vector<1x64xf32>
    %cst = arith.constant dense<0.000000e+00> : vector<1x64xf32>
    %5 = vector.multi_reduction <add>, %3, %cst [2] : vector<1x64x256xf32> to vector<1x64xf32>
    %6 = arith.addf %4, %5 : vector<1x64xf32>
    %c0_5 = arith.constant 0 : index
    %c0_6 = arith.constant 0 : index
    %7 = vector.load %arg5[%c0_5, %c0_6] : memref<1x64xf32, #tpu.memory_space<vmem>>, vector<1x64xf32>
    tpu.vector_store %arg5[%c0_5, %c0_6], %6 {strides = array<i32>} : memref<1x64xf32, #tpu.memory_space<vmem>>, vector<1x64xf32>,
    %c0_7 = arith.constant 0 : index
    %c0_8 = arith.constant 0 : index
    %8 = vector.load %arg6[%c0_7, %c0_8] : memref<1x64xf32, #tpu.memory_space<vmem>>, vector<1x64xf32>
    %cst_9 = arith.constant dense<0xFF800000> : vector<1x64xf32>
    %9 = vector.multi_reduction <maximumf>, %3, %cst_9 [2] : vector<1x64x256xf32> to vector<1x64xf32>
    %10 = arith.maximumf %8, %9 : vector<1x64xf32>
    %c0_10 = arith.constant 0 : index
    %c0_11 = arith.constant 0 : index
    %11 = vector.load %arg6[%c0_10, %c0_11] : memref<1x64xf32, #tpu.memory_space<vmem>>, vector<1x64xf32>
    tpu.vector_store %arg6[%c0_10, %c0_11], %10 {strides = array<i32>} : memref<1x64xf32, #tpu.memory_space<vmem>>, vector<1x64xf32>,
    %c0_i32_12 = arith.constant 0 : i32
    %12 = arith.cmpi eq, %arg1, %c0_i32_12 : i32
    %13 = arith.extui %12 : i1 to i32
    %c0_i32_13 = arith.constant 0 : i32
    %14 = arith.cmpi ne, %13, %c0_i32_13 : i32
    scf.if %14 {
      %c0_14 = arith.constant 0 : index
      %c0_15 = arith.constant 0 : index
      %15 = vector.load %arg5[%c0_14, %c0_15] : memref<1x64xf32, #tpu.memory_space<vmem>>, vector<1x64xf32>
      %cst_16 = arith.constant 3.906250e-03 : f32
      %16 = vector.broadcast %cst_16 : f32 to vector<1x64xf32>
      %17 = arith.mulf %15, %16 : vector<1x64xf32>
      %18 = vector.shape_cast %17 : vector<1x64xf32> to vector<1x64x1xf32>
      %c0_17 = arith.constant 0 : index
      %c0_18 = arith.constant 0 : index
      %c0_19 = arith.constant 0 : index
      %19 = vector.load %arg3[%c0_17, %c0_18, %c0_19] : memref<1x64x1xf32, #tpu.memory_space<vmem>>, vector<1x64x1xf32>
      tpu.vector_store %arg3[%c0_17, %c0_18, %c0_19], %18 {strides = array<i32>} : memref<1x64x1xf32, #tpu.memory_space<vmem>>, vector<1x64x1xf32>,
      %c0_20 = arith.constant 0 : index
      %c0_21 = arith.constant 0 : index
      %20 = vector.load %arg6[%c0_20, %c0_21] : memref<1x64xf32, #tpu.memory_space<vmem>>, vector<1x64xf32>
      %21 = vector.shape_cast %20 : vector<1x64xf32> to vector<1x64x1xf32>
      %c0_22 = arith.constant 0 : index
      %c0_23 = arith.constant 0 : index
      %c0_24 = arith.constant 0 : index
      %22 = vector.load %arg4[%c0_22, %c0_23, %c0_24] : memref<1x64x1xf32, #tpu.memory_space<vmem>>, vector<1x64x1xf32>
      tpu.vector_store %arg4[%c0_22, %c0_23, %c0_24], %21 {strides = array<i32>} : memref<1x64x1xf32, #tpu.memory_space<vmem>>, vector<1x64x1xf32>,
    } else {
    }
    return
  }
  func.func @transform_0(%arg0: i32, %arg1: i32) -> (i32, i32, i32) {
    %c0_i32 = arith.constant 0 : i32
    %c0_i32_0 = arith.constant 0 : i32
    return %arg0, %c0_i32, %arg1 : i32, i32, i32
  }
  func.func @transform_1(%arg0: i32, %arg1: i32) -> (i32, i32, i32) {
    %c0_i32 = arith.constant 0 : i32
    %c0_i32_0 = arith.constant 0 : i32
    %c0_i32_1 = arith.constant 0 : i32
    return %arg0, %c0_i32, %c0_i32_0 : i32, i32, i32
  }
  func.func @transform_2(%arg0: i32, %arg1: i32) -> (i32, i32, i32) {
    %c0_i32 = arith.constant 0 : i32
    %c0_i32_0 = arith.constant 0 : i32
    %c0_i32_1 = arith.constant 0 : i32
    return %arg0, %c0_i32, %c0_i32_0 : i32, i32, i32
  }
}

module attributes {stable_mosaic.version = 11 : i64} {
  func.func @_scale_kernel(%arg0: i32, %arg1: i32, %arg2: memref<1x64x256xf32, #tpu.memory_space<vmem>>, %arg3: memref<1x64x1xf32, #tpu.memory_space<vmem>>, %arg4: memref<1x64x256xf32, #tpu.memory_space<vmem>>) attributes {dimension_semantics = [#tpu.dimension_semantics<parallel>, #tpu.dimension_semantics<parallel>], iteration_bounds = array<i64: 2, 1>, scalar_prefetch = 0 : i64, scratch_operands = 0 : i64, tpu.core_type = #tpu.core_type<tc>, window_params = [{transform_indices = @transform_0, window_bounds = array<i64: 1, 64, 256>}, {transform_indices = @transform_1, window_bounds = array<i64: 1, 64, 1>}, {transform_indices = @transform_2, window_bounds = array<i64: 1, 64, 256>}]} {
    %c0 = arith.constant 0 : index
    %c0_0 = arith.constant 0 : index
    %c0_1 = arith.constant 0 : index
    %0 = vector.load %arg2[%c0, %c0_0, %c0_1] : memref<1x64x256xf32, #tpu.memory_space<vmem>>, vector<1x64x256xf32>
    %c0_2 = arith.constant 0 : index
    %c0_3 = arith.constant 0 : index
    %c0_4 = arith.constant 0 : index
    %1 = vector.load %arg3[%c0_2, %c0_3, %c0_4] : memref<1x64x1xf32, #tpu.memory_space<vmem>>, vector<1x64x1xf32>
    %2 = vector.broadcast %1 : vector<1x64x1xf32> to vector<1x64x256xf32>
    %3 = arith.mulf %0, %2 : vector<1x64x256xf32>
    %c0_5 = arith.constant 0 : index
    %c0_6 = arith.constant 0 : index
    %c0_7 = arith.constant 0 : index
    %4 = vector.load %arg4[%c0_5, %c0_6, %c0_7] : memref<1x64x256xf32, #tpu.memory_space<vmem>>, vector<1x64x256xf32>
    tpu.vector_store %arg4[%c0_5, %c0_6, %c0_7], %3 {strides = array<i32>} : memref<1x64x256xf32, #tpu.memory_space<vmem>>, vector<1x64x256xf32>,
    return
  }
  func.func @transform_0(%arg0: i32, %arg1: i32) -> (i32, i32, i32) {
    %c0_i32 = arith.constant 0 : i32
    %c0_i32_0 = arith.constant 0 : i32
    return %arg0, %c0_i32, %arg1 : i32, i32, i32
  }
  func.func @transform_1(%arg0: i32, %arg1: i32) -> (i32, i32, i32) {
    %c0_i32 = arith.constant 0 : i32
    %c0_i32_0 = arith.constant 0 : i32
    %c0_i32_1 = arith.constant 0 : i32
    return %arg0, %c0_i32, %c0_i32_0 : i32, i32, i32
  }
  func.func @transform_2(%arg0: i32, %arg1: i32) -> (i32, i32, i32) {
    %c0_i32 = arith.constant 0 : i32
    %c0_i32_0 = arith.constant 0 : i32
    return %arg0, %c0_i32, %arg1 : i32, i32, i32
  }
}

</mosaic_0001>

<bundles_post_ra>
// kernel: channel_gate.3
= control target key start
LH: loop header
LB: loop body
LE: loop exit
PB: predicated region body
PF: predicated region fallthrough
CT: control target
= control target key end

     0   :  { %s481_s9 = smov 0   ;;  %s483_s10 = smov 0   ;;  %s553_s0 = inlined_call_operand.vmem [shape: f32[2,64,256], index: 0, kind: input, shape index: {}]   ;;  %s554_s1 = inlined_call_operand.vmem [shape: f32[2,64,1], index: 1, kind: input, shape index: {}]   ;;  %s555_s2 = inlined_call_operand.vmem [shape: f32[2,64,256], index: 2, kind: output, shape index: {}]  }
   0x1   :  { %s485_s11 = smov 0  }
   0x2 LB: > { %s24_s12 = sadd.s32 1, %s459_s10  ;;  %p402_p0 = scmp.ge.s32.totalorder %s463_s11, 1  ;;  %s463_s11 = sphi %s485_s11, %s12_s11   ;;  %s459_s10 = sphi %s483_s10, %s557_s10   ;;  %s455_s9 = sphi %s481_s9, %s556_s9  }
   0x3   : > { %p26_p1 = scmp.ge.s32.totalorder %s24_s12, 2  ;;  %p143_p2 = scmp.lt.s32.totalorder %s463_s11, 3 }
   0x5   : > { %s559_s12 = smov (%p26_p1, %s24_s12), 0  ;;  %p144_p3 = pnand %p402_p0, %p143_p2 }
   0x6   : > { %p179_p4 = scmp.lt.s32.totalorder (!%p144_p3), %s455_s9, 1  ;;  %v465_v0 = vmov (!%p144_p3), 0  }
   0x7   : > { %147 = sbr.rel (%p144_p3) target bundleno = 162 (0xa2), region = 28  ;;  %440 = vset.pattern.permute.xlu1 (!%p144_p3), %v465_v0  ;;  %439 = vset.pattern.permute.xlu0 (!%p144_p3), %v465_v0 }
   0xe   : > { %s561_s9 = smov (!%p179_p4, %s455_s9), 1 }
   0xf   : > { %s412_s13 = sshll.u32 %s561_s9, 6  ;;  %s411_s17 = sshll.u32 %s561_s9, 7 }
  0x10   : > { %s192_s16 = scalar_lea.vmem %s554_s1, %s412_s13  ;;  %s505_s20 = scalar_lea.vmem %s553_s0, %s411_s17 }
  0x11   : > { %v221_v1 = vld [vmem:[%s192_s16 + $0x10] sm:$0xff]  ;;  %v219_v2 = vld [vmem:[%s192_s16] sm:$0xff]  ;;  %v222_v3 = vld [vmem:[%s192_s16 + $0x18] sm:$0xff]  ;;  %s514_s23 = scalar_lea.vmem %s555_s2, %s411_s17 }
  0x12   : > { %239 = vperm.xlu1 %440, %v221_v1   ;;  %229 = vperm.xlu0 %439, %v219_v2   ;;  %v220_v4 = vld [vmem:[%s192_s16 + $0x8] sm:$0xff]  ;;  %v223_v6 = vld [vmem:[%s192_s16 + $0x20] sm:$0xff]  ;;  %v226_v7 = vld [vmem:[%s192_s16 + $0x38] sm:$0xff] }
  0x13   : > { %v224_v5 = vld [vmem:[%s192_s16 + $0x28] sm:$0xff]  ;;  %v225_v8 = vld [vmem:[%s192_s16 + $0x30] sm:$0xff]  ;;  %v207_v9 = vld [vmem:[%s505_s20 + $0x20] sm:$0xff] }
  0x14   : > { %v208_v10 = vld [vmem:[%s505_s20 + $0x28] sm:$0xff]  ;;  %v203_v11 = vld [vmem:[%s505_s20] sm:$0xff]  ;;  %v209_v19 = vld [vmem:[%s505_s20 + $0x30] sm:$0xff] }
  0x15   : > { %v204_v12 = vld [vmem:[%s505_s20 + $0x8] sm:$0xff]  ;;  %v210_v20 = vld [vmem:[%s505_s20 + $0x38] sm:$0xff]  ;;  %v205_v21 = vld [vmem:[%s505_s20 + $0x10] sm:$0xff] }
  0x16   : > { %244 = vperm.xlu1 %440, %v222_v3   ;;  %234 = vperm.xlu0 %439, %v220_v4   ;;  %v206_v22 = vld [vmem:[%s505_s20 + $0x18] sm:$0xff]  ;;  %v213_v29 = vld [vmem:[%s505_s20 + $0x50] sm:$0xff]  ;;  %v211_v31 = vld [vmem:[%s505_s20 + $0x40] sm:$0xff] }
  0x17   : > { %v214_v30 = vld [vmem:[%s505_s20 + $0x58] sm:$0xff]  ;;  %v212_v32 = vld [vmem:[%s505_s20 + $0x48] sm:$0xff]  ;;  %v217_v39 = vld [vmem:[%s505_s20 + $0x70] sm:$0xff] }
  0x18   : > { %v218_v40 = vld [vmem:[%s505_s20 + $0x78] sm:$0xff]  ;;  %v215_v41 = vld [vmem:[%s505_s20 + $0x60] sm:$0xff]  ;;  %v216_v42 = vld [vmem:[%s505_s20 + $0x68] sm:$0xff] }
  0x1a   : > { %254 = vperm.xlu1 %440, %v224_v5   ;;  %249 = vperm.xlu0 %439, %v223_v6  }
  0x1e   : > { %264 = vperm.xlu1 %440, %v226_v7   ;;  %259 = vperm.xlu0 %439, %v225_v8  }
  0x91   : > { %v240_v13 = vpop.permute.xlu1 %239  ;;  %v230_v14 = vpop.permute.xlu0 %229 }
  0x92   : > { %v271_v15 = vmul.f32 %v240_v13, %v207_v9  ;;  %v272_v16 = vmul.f32 %v240_v13, %v208_v10  ;;  %v267_v17 = vmul.f32 %v230_v14, %v203_v11  ;;  %v268_v18 = vmul.f32 %v230_v14, %v204_v12 }
  0x94   : > { %287 = vst [vmem:[%s514_s23 + $0x20] sm:$0xff] %v271_v15  ;;  %288 = vst [vmem:[%s514_s23 + $0x28] sm:$0xff] %v272_v16 }
  0x95   : > { %283 = vst [vmem:[%s514_s23] sm:$0xff] %v267_v17  ;;  %284 = vst [vmem:[%s514_s23 + $0x8] sm:$0xff] %v268_v18  ;;  %v245_v23 = vpop.permute.xlu1 %244  ;;  %v235_v24 = vpop.permute.xlu0 %234 }
  0x96   : > { %v273_v25 = vmul.f32 %v245_v23, %v209_v19  ;;  %v274_v26 = vmul.f32 %v245_v23, %v210_v20  ;;  %v269_v27 = vmul.f32 %v235_v24, %v205_v21  ;;  %v270_v28 = vmul.f32 %v235_v24, %v206_v22 }
  0x98   : > { %289 = vst [vmem:[%s514_s23 + $0x30] sm:$0xff] %v273_v25  ;;  %290 = vst [vmem:[%s514_s23 + $0x38] sm:$0xff] %v274_v26 }
  0x99   : > { %285 = vst [vmem:[%s514_s23 + $0x10] sm:$0xff] %v269_v27  ;;  %286 = vst [vmem:[%s514_s23 + $0x18] sm:$0xff] %v270_v28  ;;  %v255_v33 = vpop.permute.xlu1 %254  ;;  %v250_v34 = vpop.permute.xlu0 %249 }
  0x9a   : > { %v277_v35 = vmul.f32 %v255_v33, %v213_v29  ;;  %v278_v36 = vmul.f32 %v255_v33, %v214_v30  ;;  %v275_v37 = vmul.f32 %v250_v34, %v211_v31  ;;  %v276_v38 = vmul.f32 %v250_v34, %v212_v32 }
  0x9c   : > { %293 = vst [vmem:[%s514_s23 + $0x50] sm:$0xff] %v277_v35  ;;  %294 = vst [vmem:[%s514_s23 + $0x58] sm:$0xff] %v278_v36 }
  0x9d   : > { %291 = vst [vmem:[%s514_s23 + $0x40] sm:$0xff] %v275_v37  ;;  %292 = vst [vmem:[%s514_s23 + $0x48] sm:$0xff] %v276_v38  ;;  %v265_v43 = vpop.permute.xlu1 %264  ;;  %v260_v44 = vpop.permute.xlu0 %259 }
  0x9e   : > { %v281_v45 = vmul.f32 %v265_v43, %v217_v39  ;;  %v282_v46 = vmul.f32 %v265_v43, %v218_v40  ;;  %v279_v47 = vmul.f32 %v260_v44, %v215_v41  ;;  %v280_v48 = vmul.f32 %v260_v44, %v216_v42 }
  0xa0   : > { %297 = vst [vmem:[%s514_s23 + $0x70] sm:$0xff] %v281_v45  ;;  %298 = vst [vmem:[%s514_s23 + $0x78] sm:$0xff] %v282_v46 }
  0xa1   : > { %295 = vst [vmem:[%s514_s23 + $0x60] sm:$0xff] %v279_v47  ;;  %296 = vst [vmem:[%s514_s23 + $0x68] sm:$0xff] %v280_v48 }
  0xa2 PF: > { %s12_s11 = sadd.s32 1, %s463_s11   ;;  %s556_s9 = smov %s459_s10 }
  0xa3   : > { %p9_p5 = scmp.ge.s32.totalorder %s12_s11, 4   ;;  %s557_s10 = smov %s559_s12 }
  0xa5   :  { %11 = sbr.rel (!%p9_p5) target bundleno = 2 (0x2), region = 61 }

// kernel: channel_gate.2
= control target key start
LH: loop header
LB: loop body
LE: loop exit
PB: predicated region body
PF: predicated region fallthrough
CT: control target
= control target key end

     0   :  { %s2032_s9 = smov 0   ;;  %s2034_s10 = smov 0   ;;  %s2432_s0 = inlined_call_operand.vmem [shape: f32[2,64,256], index: 0, kind: input, shape index: {}]   ;;  %s2433_s1 = inlined_call_operand.vmem [shape: f32[2,64,1], index: 1, kind: output, shape index: {0}]   ;;  %s2434_s2 = inlined_call_operand.vmem [shape: f32[2,64,1], index: 2, kind: output, shape index: {1}]  }
   0x1   :  { %s2036_s11 = smov 0  }
   0x2 LB: > { %s25_s12 = sadd.s32 1, %s2007_s10  ;;  %p1946_p0 = scmp.ge.s32.totalorder %s2011_s11, 1  ;;  %s2011_s11 = sphi %s2036_s11, %s13_s11   ;;  %s2007_s10 = sphi %s2034_s10, %s2436_s10   ;;  %s2003_s9 = sphi %s2032_s9, %s2435_s9  }
   0x3   : > { %p27_p1 = scmp.ge.s32.totalorder %s25_s12, 2  ;;  %p134_p2 = scmp.lt.s32.totalorder %s2011_s11, 3 }
   0x5   : > { %s2438_s12 = smov (%p27_p1, %s25_s12), 0  ;;  %p135_p3 = pnand %p1946_p0, %p134_p2 }
   0x6   : > { %p166_p4 = scmp.lt.s32.totalorder (!%p135_p3), %s2003_s9, 1  ;;  %v2013_v30 = vmov (!%p135_p3), 0   ;;  %v241_v33 = vlaneseq (!%p135_p3)  ;;  %v2014_v34 = vmov (!%p135_p3), 1966171168   ;;  %vm189_vm0 = vcmask (!%p135_p3), 516096  }
   0x7   : > { %138 = sbr.rel (%p135_p3) target bundleno = 543 (0x21f), region = 24  ;;  %1987 = vset.pattern.permute.xlu0 (!%p135_p3), %v2013_v30  ;;  %1988 = vset.pattern.permute.xlu1 (!%p135_p3), %v2013_v30  ;;  %v502_v35 = vunpack.c.l.s4 (!%p135_p3), %v2014_v34  ;;  %vm924_vm1 = vcmask (!%p135_p3), 130112   ;;  %vm931_vm2 = vcmask (!%p135_p3), 195712   ;;  %vm938_vm3 = vcmask (!%p135_p3), 261312  }
   0x8   : > { %v2075_v36 = vshrl.u32 (!%p135_p3), %v241_v33, 7  ;;  %vm945_vm4 = vcmask (!%p135_p3), 326912   ;;  %vm952_vm5 = vcmask (!%p135_p3), 392512   ;;  %vm959_vm6 = vcmask (!%p135_p3), 458112  }
   0x9   : > { %v503_v37 = vunpack.c.0.s8 (!%p135_p3), %v502_v35  ;;  %vm966_vm7 = vcmask (!%p135_p3), 523712   ;;  %vm1787_vm8 = vcmask (!%p135_p3), 7168  }
   0xa   : > { %v2078_v38 = vsub.s32 (!%p135_p3), 0, %v2075_v36  ;;  %v2081_v39 = vsub.s32 (!%p135_p3), 1, %v2075_v36  ;;  %v2084_v40 = vsub.s32 (!%p135_p3), 2, %v2075_v36  ;;  %v2087_v41 = vsub.s32 (!%p135_p3), 3, %v2075_v36 }
   0xb   : > { %v2090_v42 = vsub.s32 (!%p135_p3), 4, %v2075_v36  ;;  %v2093_v43 = vsub.s32 (!%p135_p3), 5, %v2075_v36  ;;  %v2096_v44 = vsub.s32 (!%p135_p3), 6, %v2075_v36  ;;  %v2099_v45 = vsub.s32 (!%p135_p3), 7, %v2075_v36 }
   0xc   : > { %v2102_v47 = vsub.s32 (!%p135_p3), %v503_v37, %v2075_v36 }
   0xe   : > { %s2440_s9 = smov (!%p166_p4, %s2003_s9), 1 }
   0xf   : > { %s1956_s13 = sshll.u32 %s2440_s9, 7  ;;  %s1957_s17 = sshll.u32 %s2440_s9, 6 }
  0x10   : > { %s2056_s16 = scalar_lea.vmem %s2432_s0, %s1956_s13  ;;  %s2394_s20 = scalar_lea.vmem %s2434_s2, %s1957_s17 }
  0x11   : > { %v192_v0 = vld [vmem:[%s2056_s16] sm:$0xff]  ;;  %v193_v1 = vld [vmem:[%s2056_s16 + $0x8] sm:$0xff]  ;;  %v194_v5 = vld [vmem:[%s2056_s16 + $0x10] sm:$0xff]  ;;  %s179_s23 = scalar_lea.vmem %s2433_s1, %s1957_s17 }
  0x12   : > { %v196_v2 = vld [vmem:[%s2056_s16 + $0x20] sm:$0xff]  ;;  %v209_v3 = vadd.f32 %v193_v1, %v192_v0  ;;  %v197_v4 = vld [vmem:[%s2056_s16 + $0x28] sm:$0xff]  ;;  %v195_v6 = vld [vmem:[%s2056_s16 + $0x18] sm:$0xff]  ;;  %v987_v18 = vmax.f32 %v192_v0, %v193_v1 }
  0x13   : > { %v215_v7 = vadd.f32 %v197_v4, %v196_v2  ;;  %v198_v8 = vld [vmem:[%s2056_s16 + $0x30] sm:$0xff]  ;;  %v199_v9 = vld [vmem:[%s2056_s16 + $0x38] sm:$0xff]  ;;  %v212_v10 = vadd.f32 %v195_v6, %v194_v5  ;;  %v200_v12 = vld [vmem:[%s2056_s16 + $0x40] sm:$0xff]  ;;  %v990_v19 = vmax.f32 %v194_v5, %v195_v6  ;;  %v993_v23 = vmax.f32 %v196_v2, %v197_v4 }
  0x14   : > { %210 = vadd.xlane.f32.xlu0 %v209_v3  ;;  %v218_v11 = vadd.f32 %v199_v9, %v198_v8  ;;  %v201_v13 = vld [vmem:[%s2056_s16 + $0x48] sm:$0xff]  ;;  %v202_v14 = vld [vmem:[%s2056_s16 + $0x50] sm:$0xff]  ;;  %v203_v15 = vld [vmem:[%s2056_s16 + $0x58] sm:$0xff]  ;;  %v996_v27 = vmax.f32 %v198_v8, %v199_v9 }
  0x15   : > { %216 = vadd.xlane.f32.xlu1 %v215_v7  ;;  %v221_v16 = vadd.f32 %v201_v13, %v200_v12  ;;  %v224_v17 = vadd.f32 %v203_v15, %v202_v14  ;;  %v204_v20 = vld [vmem:[%s2056_s16 + $0x60] sm:$0xff]  ;;  %v205_v21 = vld [vmem:[%s2056_s16 + $0x68] sm:$0xff]  ;;  %v206_v24 = vld [vmem:[%s2056_s16 + $0x70] sm:$0xff]  ;;  %v999_v28 = vmax.f32 %v200_v12, %v201_v13  ;;  %v1002_v29 = vmax.f32 %v202_v14, %v203_v15 }
  0x16   : > { %v227_v22 = vadd.f32 %v205_v21, %v204_v20  ;;  %v207_v25 = vld [vmem:[%s2056_s16 + $0x78] sm:$0xff]  ;;  %v1005_v31 = vmax.f32 %v204_v20, %v205_v21 }
  0x17   : > { %v230_v26 = vadd.f32 %v207_v25, %v206_v24  ;;  %v1008_v32 = vmax.f32 %v206_v24, %v207_v25 }
  0x18   : > { %213 = vadd.xlane.f32.xlu0 %v212_v10 }
  0x19   : > { %219 = vadd.xlane.f32.xlu1 %v218_v11 }
  0x1c   : > { %222 = vadd.xlane.f32.xlu0 %v221_v16 }
  0x1d   : > { %225 = vadd.xlane.f32.xlu1 %v224_v17 }
  0x20   : > { %988 = vmax.xlane.f32.xlu0 %v987_v18 }
  0x21   : > { %991 = vmax.xlane.f32.xlu1 %v990_v19 }
  0x24   : > { %228 = vadd.xlane.f32.xlu0 %v227_v22 }
  0x25   : > { %994 = vmax.xlane.f32.xlu1 %v993_v23 }
  0x28   : > { %231 = vadd.xlane.f32.xlu0 %v230_v26 }
  0x29   : > { %997 = vmax.xlane.f32.xlu1 %v996_v27 }
  0x2c   : > { %1000 = vmax.xlane.f32.xlu0 %v999_v28 }
  0x2d   : > { %1003 = vmax.xlane.f32.xlu1 %v1002_v29 }
  0x30   : > { %1006 = vmax.xlane.f32.xlu0 %v1005_v31 }
  0x31   : > { %1009 = vmax.xlane.f32.xlu1 %v1008_v32 }
  0xa1   : > { %v211_v46 = vpop.xlane.xlu0 %210 }
  0xa2   : > { %v217_v48 = vpop.xlane.xlu1 %216  ;;  %v244_v49 = vrot.slane %v211_v46, %v2078_v38  ;;  %v248_v50 = vrot.slane %v211_v46, %v2081_v39  ;;  %v252_v51 = vrot.slane %v211_v46, %v2084_v40  ;;  %v256_v52 = vrot.slane %v211_v46, %v2087_v41 }
  0xa3   : > { %v260_v53 = vrot.slane %v211_v46, %v2090_v42  ;;  %v264_v54 = vrot.slane %v211_v46, %v2093_v43  ;;  %v268_v55 = vrot.slane %v211_v46, %v2096_v44  ;;  %v272_v56 = vrot.slane %v211_v46, %v2099_v45 }
  0xa4   : > { %v497_v57 = vcombine.low %v244_v49, %v248_v50  ;;  %v498_v58 = vcombine.low %v252_v51, %v256_v52  ;;  %v308_v59 = vrot.slane %v217_v48, %v2078_v38  ;;  %v312_v60 = vrot.slane %v217_v48, %v2081_v39 }
  0xa5   : > { %v214_v61 = vpop.xlane.xlu0 %213  ;;  %v499_v62 = vcombine.low %v260_v53, %v264_v54  ;;  %v500_v63 = vcombine.low %v268_v55, %v272_v56  ;;  %v316_v0 = vrot.slane %v217_v48, %v2084_v40  ;;  %v320_v1 = vrot.slane %v217_v48, %v2087_v41 }
  0xa6   : > { %v2116_v2 = vpop.xlane.xlu1 %219  ;;  %v507_v3 = vrot.slane %v497_v57, %v2102_v47  ;;  %v514_v4 = vrot.slane %v498_v58, %v2102_v47  ;;  %v276_v5 = vrot.slane %v214_v61, %v2078_v38  ;;  %v280_v6 = vrot.slane %v214_v61, %v2081_v39 }
  0xa7   : > { %v521_v7 = vrot.slane %v499_v62, %v2102_v47  ;;  %v528_v8 = vrot.slane %v500_v63, %v2102_v47  ;;  %v284_v9 = vrot.slane %v214_v61, %v2084_v40  ;;  %v288_v10 = vrot.slane %v214_v61, %v2087_v41 }
  0xa8   : > { %v529_v11 = vcombine.low %v507_v3, %v514_v4  ;;  %v292_v12 = vrot.slane %v214_v61, %v2090_v42  ;;  %v296_v13 = vrot.slane %v214_v61, %v2093_v43  ;;  %v300_v14 = vrot.slane %v214_v61, %v2096_v44 }
  0xa9   : > { %v530_v15 = vcombine.low %v521_v7, %v528_v8  ;;  %v304_v16 = vrot.slane %v214_v61, %v2099_v45  ;;  %v546_v17 = vcombine.low %v276_v5, %v280_v6  ;;  %v547_v18 = vcombine.low %v284_v9, %v288_v10 }
  0xaa   : > { %v2130_v19 = vpop.xlane.xlu1 %225  ;;  %v537_v20 = vrot.slane %v529_v11, %v2102_v47  ;;  %v548_v21 = vcombine.low %v292_v12, %v296_v13  ;;  %v324_v22 = vrot.slane %v217_v48, %v2090_v42  ;;  %v328_v23 = vrot.slane %v217_v48, %v2093_v43 }
  0xab   : > { %v544_v24 = vrot.slane %v530_v15, %v2102_v47  ;;  %v549_v25 = vcombine.low %v300_v14, %v304_v16  ;;  %v556_v26 = vrot.slane %v546_v17, %v2102_v47  ;;  %v563_v27 = vrot.slane %v547_v18, %v2102_v47 }
  0xac   : > { %v570_v28 = vrot.slane %v548_v21, %v2102_v47  ;;  %v332_v29 = vrot.slane %v217_v48, %v2096_v44  ;;  %v336_v30 = vrot.slane %v217_v48, %v2099_v45  ;;  %v595_v31 = vcombine.low %v308_v59, %v312_v60  ;;  %v223_v60 = vpop.xlane.xlu0 %222 }
  0xad   : > { %v545_v32 = vcombine.low %v537_v20, %v544_v24  ;;  %v577_v34 = vrot.slane %v549_v25, %v2102_v47  ;;  %v578_v35 = vcombine.low %v556_v26, %v563_v27  ;;  %v596_v37 = vcombine.low %v316_v0, %v320_v1 }
  0xae   : > { %v597_v46 = vcombine.low %v324_v22, %v328_v23  ;;  %v598_v49 = vcombine.low %v332_v29, %v336_v30  ;;  %v605_v50 = vrot.slane %v595_v31, %v2102_v47  ;;  %v340_v51 = vrot.slane %v2116_v2, %v2078_v38  ;;  %v2145_v52 = vpop.xlane.xlu1 %991 }
  0xaf   : > { %890 = vperm.xlu0 %1987, %v545_v32   ;;  %v579_v53 = vcombine.low %v570_v28, %v577_v34  ;;  %v586_v54 = vrot.slane %v578_v35, %v2102_v47  ;;  %v612_v48 = vrot.slane %v596_v37, %v2102_v47  ;;  %v344_v55 = vrot.slane %v2116_v2, %v2081_v39 }
  0xb0   : > { %v619_v56 = vrot.slane %v597_v46, %v2102_v47  ;;  %v626_v57 = vrot.slane %v598_v49, %v2102_v47  ;;  %v348_v58 = vrot.slane %v2116_v2, %v2084_v40  ;;  %v352_v59 = vrot.slane %v2116_v2, %v2087_v41 }
  0xb1   : > { %v593_v61 = vrot.slane %v579_v53, %v2102_v47  ;;  %v627_v62 = vcombine.low %v605_v50, %v612_v48  ;;  %v356_v63 = vrot.slane %v2116_v2, %v2090_v42  ;;  %v360_v0 = vrot.slane %v2116_v2, %v2093_v43 }
  0xb2   : > { %v628_v1 = vcombine.low %v619_v56, %v626_v57  ;;  %v364_v3 = vrot.slane %v2116_v2, %v2096_v44  ;;  %v368_v4 = vrot.slane %v2116_v2, %v2099_v45  ;;  %v644_v5 = vcombine.low %v340_v51, %v344_v55  ;;  %v995_v14 = vpop.xlane.xlu1 %994 }
  0xb3   : > { %v594_v6 = vcombine.low %v586_v54, %v593_v61  ;;  %v635_v7 = vrot.slane %v627_v62, %v2102_v47  ;;  %v645_v8 = vcombine.low %v348_v58, %v352_v59  ;;  %v646_v9 = vcombine.low %v356_v63, %v360_v0 }
  0xb4   : > { %v642_v10 = vrot.slane %v628_v1, %v2102_v47  ;;  %v647_v11 = vcombine.low %v364_v3, %v368_v4  ;;  %v654_v12 = vrot.slane %v644_v5, %v2102_v47  ;;  %v372_v13 = vrot.slane %v223_v60, %v2078_v38 }
  0xb5   : > { %893 = vperm.xlu1 %1988, %v594_v6   ;;  %v661_v15 = vrot.slane %v645_v8, %v2102_v47  ;;  %v668_v16 = vrot.slane %v646_v9, %v2102_v47  ;;  %v376_v2 = vrot.slane %v223_v60, %v2081_v39  ;;  %v380_v17 = vrot.slane %v223_v60, %v2084_v40 }
  0xb6   : > { %v643_v18 = vcombine.low %v635_v7, %v642_v10  ;;  %v675_v20 = vrot.slane %v647_v11, %v2102_v47  ;;  %v384_v21 = vrot.slane %v223_v60, %v2087_v41  ;;  %v388_v22 = vrot.slane %v223_v60, %v2090_v42  ;;  %v998_v8 = vpop.xlane.xlu1 %997 }
  0xb7   : > { %v676_v23 = vcombine.low %v654_v12, %v661_v15  ;;  %v392_v24 = vrot.slane %v223_v60, %v2093_v43  ;;  %v396_v25 = vrot.slane %v223_v60, %v2096_v44  ;;  %v400_v26 = vrot.slane %v223_v60, %v2099_v45 }
  0xb8   : > { %v677_v27 = vcombine.low %v668_v16, %v675_v20  ;;  %v693_v28 = vcombine.low %v372_v13, %v376_v2  ;;  %v694_v29 = vcombine.low %v380_v17, %v384_v21  ;;  %v1086_v30 = vrot.slane %v995_v14, %v2078_v38 }
  0xb9   : > { %896 = vperm.xlu1 %1988, %v643_v18   ;;  %v684_v31 = vrot.slane %v676_v23, %v2102_v47  ;;  %v695_v32 = vcombine.low %v388_v22, %v392_v24  ;;  %v696_v34 = vcombine.low %v396_v25, %v400_v26  ;;  %v1090_v35 = vrot.slane %v995_v14, %v2081_v39 }
  0xba   : > { %v691_v37 = vrot.slane %v677_v27, %v2102_v47  ;;  %v703_v46 = vrot.slane %v693_v28, %v2102_v47  ;;  %v710_v49 = vrot.slane %v694_v29, %v2102_v47  ;;  %v1094_v50 = vrot.slane %v995_v14, %v2084_v40 }
  0xbb   : > { %v717_v51 = vrot.slane %v695_v32, %v2102_v47  ;;  %v724_v53 = vrot.slane %v696_v34, %v2102_v47  ;;  %v1098_v54 = vrot.slane %v995_v14, %v2087_v41  ;;  %v1102_v48 = vrot.slane %v995_v14, %v2090_v42  ;;  %v989_v32 = vpop.xlane.xlu0 %988 }
  0xbc   : > { %v692_v55 = vcombine.low %v684_v31, %v691_v37  ;;  %v725_v56 = vcombine.low %v703_v46, %v710_v49  ;;  %v1106_v57 = vrot.slane %v995_v14, %v2093_v43  ;;  %v1110_v58 = vrot.slane %v995_v14, %v2096_v44 }
  0xbd   : > { %v726_v59 = vcombine.low %v717_v51, %v724_v53  ;;  %v1114_v60 = vrot.slane %v995_v14, %v2099_v45  ;;  %v1373_v61 = vcombine.low %v1086_v30, %v1090_v35  ;;  %v1374_v62 = vcombine.low %v1094_v50, %v1098_v54 }
  0xbe   : > { %899 = vperm.xlu1 %1988, %v692_v55   ;;  %v733_v63 = vrot.slane %v725_v56, %v2102_v47  ;;  %v1375_v0 = vcombine.low %v1102_v48, %v1106_v57  ;;  %v404_v1 = vrot.slane %v2130_v19, %v2078_v38  ;;  %v408_v3 = vrot.slane %v2130_v19, %v2081_v39 }
  0xbf   : > { %v740_v4 = vrot.slane %v726_v59, %v2102_v47  ;;  %v1376_v5 = vcombine.low %v1110_v58, %v1114_v60  ;;  %v1383_v6 = vrot.slane %v1373_v61, %v2102_v47  ;;  %v1390_v7 = vrot.slane %v1374_v62, %v2102_v47 }
  0xc0   : > { %v1397_v9 = vrot.slane %v1375_v0, %v2102_v47  ;;  %v412_v10 = vrot.slane %v2130_v19, %v2084_v40  ;;  %v416_v11 = vrot.slane %v2130_v19, %v2087_v41  ;;  %v420_v12 = vrot.slane %v2130_v19, %v2090_v42 }
  0xc1   : > { %v741_v13 = vcombine.low %v733_v63, %v740_v4  ;;  %v1404_v14 = vrot.slane %v1376_v5, %v2102_v47  ;;  %v1405_v15 = vcombine.low %v1383_v6, %v1390_v7  ;;  %v424_v16 = vrot.slane %v2130_v19, %v2093_v43 }
  0xc2   : > { %v428_v2 = vrot.slane %v2130_v19, %v2096_v44  ;;  %v432_v17 = vrot.slane %v2130_v19, %v2099_v45  ;;  %v742_v18 = vcombine.low %v404_v1, %v408_v3  ;;  %v743_v20 = vcombine.low %v412_v10, %v416_v11  ;;  %v1004_v1 = vpop.xlane.xlu1 %1003 }
  0xc3   : > { %902 = vperm.xlu1 %1988, %v741_v13   ;;  %v1406_v21 = vcombine.low %v1397_v9, %v1404_v14  ;;  %v1413_v22 = vrot.slane %v1405_v15, %v2102_v47  ;;  %v744_v23 = vcombine.low %v420_v12, %v424_v16  ;;  %v1118_v24 = vrot.slane %v998_v8, %v2078_v38 }
  0xc4   : > { %v745_v25 = vcombine.low %v428_v2, %v432_v17  ;;  %v752_v26 = vrot.slane %v742_v18, %v2102_v47  ;;  %v759_v27 = vrot.slane %v743_v20, %v2102_v47  ;;  %v1122_v28 = vrot.slane %v998_v8, %v2081_v39 }
  0xc5   : > { %v1420_v29 = vrot.slane %v1406_v21, %v2102_v47  ;;  %v766_v19 = vrot.slane %v744_v23, %v2102_v47  ;;  %v1126_v30 = vrot.slane %v998_v8, %v2084_v40  ;;  %v1130_v31 = vrot.slane %v998_v8, %v2087_v41 }
  0xc6   : > { %v773_v34 = vrot.slane %v745_v25, %v2102_v47  ;;  %v774_v35 = vcombine.low %v752_v26, %v759_v27  ;;  %v1134_v37 = vrot.slane %v998_v8, %v2090_v42  ;;  %v1138_v46 = vrot.slane %v998_v8, %v2093_v43 }
  0xc7   : > { %v1421_v49 = vcombine.low %v1413_v22, %v1420_v29  ;;  %v1142_v50 = vrot.slane %v998_v8, %v2096_v44  ;;  %v1146_v51 = vrot.slane %v998_v8, %v2099_v45  ;;  %v1422_v53 = vcombine.low %v1118_v24, %v1122_v28 }
  0xc8   : > { %v775_v54 = vcombine.low %v766_v19, %v773_v34  ;;  %v782_v48 = vrot.slane %v774_v35, %v2102_v47  ;;  %v1423_v55 = vcombine.low %v1126_v30, %v1130_v31  ;;  %v1424_v56 = vcombine.low %v1134_v37, %v1138_v46 }
  0xc9   : > { %1674 = vperm.xlu0 %1987, %v1421_v49   ;;  %v1425_v57 = vcombine.low %v1142_v50, %v1146_v51  ;;  %v1432_v58 = vrot.slane %v1422_v53, %v2102_v47  ;;  %v1022_v59 = vrot.slane %v989_v32, %v2078_v38  ;;  %v1026_v60 = vrot.slane %v989_v32, %v2081_v39 }
  0xca   : > { %v789_v61 = vrot.slane %v775_v54, %v2102_v47  ;;  %v1439_v62 = vrot.slane %v1423_v55, %v2102_v47  ;;  %v1446_v63 = vrot.slane %v1424_v56, %v2102_v47  ;;  %v1030_v0 = vrot.slane %v989_v32, %v2084_v40 }
  0xcb   : > { %v1453_v3 = vrot.slane %v1425_v57, %v2102_v47  ;;  %v1034_v4 = vrot.slane %v989_v32, %v2087_v41  ;;  %v1038_v5 = vrot.slane %v989_v32, %v2090_v42  ;;  %v1042_v6 = vrot.slane %v989_v32, %v2093_v43 }
  0xcc   : > { %v790_v7 = vcombine.low %v782_v48, %v789_v61  ;;  %v1454_v8 = vcombine.low %v1432_v58, %v1439_v62  ;;  %v1046_v9 = vrot.slane %v989_v32, %v2096_v44  ;;  %v1050_v10 = vrot.slane %v989_v32, %v2099_v45  ;;  %v1010_v48 = vpop.xlane.xlu1 %1009 }
  0xcd   : > { %v1455_v11 = vcombine.low %v1446_v63, %v1453_v3  ;;  %v1275_v12 = vcombine.low %v1022_v59, %v1026_v60  ;;  %v1276_v13 = vcombine.low %v1030_v0, %v1034_v4  ;;  %v1277_v14 = vcombine.low %v1038_v5, %v1042_v6  ;;  %v229_v4 = vpop.xlane.xlu0 %228 }
  0xce   : > { %905 = vperm.xlu1 %1988, %v790_v7   ;;  %v1462_v15 = vrot.slane %v1454_v8, %v2102_v47  ;;  %v1278_v16 = vcombine.low %v1046_v9, %v1050_v10  ;;  %v1182_v2 = vrot.slane %v1004_v1, %v2078_v38  ;;  %v1186_v17 = vrot.slane %v1004_v1, %v2081_v39 }
  0xcf   : > { %v1469_v18 = vrot.slane %v1455_v11, %v2102_v47  ;;  %v1285_v20 = vrot.slane %v1275_v12, %v2102_v47  ;;  %v1292_v21 = vrot.slane %v1276_v13, %v2102_v47  ;;  %v1299_v22 = vrot.slane %v1277_v14, %v2102_v47 }
  0xd0   : > { %v1306_v23 = vrot.slane %v1278_v16, %v2102_v47  ;;  %v1190_v24 = vrot.slane %v1004_v1, %v2084_v40  ;;  %v1194_v25 = vrot.slane %v1004_v1, %v2087_v41  ;;  %v1198_v26 = vrot.slane %v1004_v1, %v2090_v42 }
  0xd1   : > { %v1470_v27 = vcombine.low %v1462_v15, %v1469_v18  ;;  %v1307_v28 = vcombine.low %v1285_v20, %v1292_v21  ;;  %v1202_v29 = vrot.slane %v1004_v1, %v2093_v43  ;;  %v1206_v19 = vrot.slane %v1004_v1, %v2096_v44 }
  0xd2   : > { %v1308_v30 = vcombine.low %v1299_v22, %v1306_v23  ;;  %v1210_v31 = vrot.slane %v1004_v1, %v2099_v45  ;;  %v1520_v32 = vcombine.low %v1182_v2, %v1186_v17  ;;  %v1521_v34 = vcombine.low %v1190_v24, %v1194_v25 }
  0xd3   : > { %1677 = vperm.xlu0 %1987, %v1470_v27   ;;  %v1315_v35 = vrot.slane %v1307_v28, %v2102_v47  ;;  %v1522_v37 = vcombine.low %v1198_v26, %v1202_v29  ;;  %v1054_v46 = vrot.slane %v2145_v52, %v2078_v38  ;;  %v1058_v49 = vrot.slane %v2145_v52, %v2081_v39  ;;  %v232_v28 = vpop.xlane.xlu0 %231 }
  0xd4   : > { %v1322_v50 = vrot.slane %v1308_v30, %v2102_v47  ;;  %v1523_v51 = vcombine.low %v1206_v19, %v1210_v31  ;;  %v1530_v53 = vrot.slane %v1520_v32, %v2102_v47  ;;  %v1537_v54 = vrot.slane %v1521_v34, %v2102_v47 }
  0xd5   : > { %v1544_v55 = vrot.slane %v1522_v37, %v2102_v47  ;;  %v1062_v56 = vrot.slane %v2145_v52, %v2084_v40  ;;  %v1066_v57 = vrot.slane %v2145_v52, %v2087_v41  ;;  %v1070_v58 = vrot.slane %v2145_v52, %v2090_v42 }
  0xd6   : > { %v1323_v59 = vcombine.low %v1315_v35, %v1322_v50  ;;  %v1551_v60 = vrot.slane %v1523_v51, %v2102_v47  ;;  %v1552_v61 = vcombine.low %v1530_v53, %v1537_v54  ;;  %v1074_v62 = vrot.slane %v2145_v52, %v2093_v43 }
  0xd7   : > { %v1078_v63 = vrot.slane %v2145_v52, %v2096_v44  ;;  %v1082_v0 = vrot.slane %v2145_v52, %v2099_v45  ;;  %v1324_v1 = vcombine.low %v1054_v46, %v1058_v49  ;;  %v1325_v3 = vcombine.low %v1062_v56, %v1066_v57 }
  0xd8   : > { %1668 = vperm.xlu1 %1988, %v1323_v59   ;;  %v1553_v5 = vcombine.low %v1544_v55, %v1551_v60  ;;  %v1560_v6 = vrot.slane %v1552_v61, %v2102_v47  ;;  %v1326_v7 = vcombine.low %v1070_v58, %v1074_v62  ;;  %v1246_v8 = vrot.slane %v1010_v48, %v2078_v38 }
  0xd9   : > { %v1327_v9 = vcombine.low %v1078_v63, %v1082_v0  ;;  %v1334_v10 = vrot.slane %v1324_v1, %v2102_v47  ;;  %v1341_v11 = vrot.slane %v1325_v3, %v2102_v47  ;;  %v1250_v12 = vrot.slane %v1010_v48, %v2081_v39  ;;  %v1001_v0 = vpop.xlane.xlu0 %1000 }
  0xda   : > { %v1567_v13 = vrot.slane %v1553_v5, %v2102_v47  ;;  %v1348_v52 = vrot.slane %v1326_v7, %v2102_v47  ;;  %v1254_v14 = vrot.slane %v1010_v48, %v2084_v40  ;;  %v1258_v15 = vrot.slane %v1010_v48, %v2087_v41 }
  0xdb   : > { %v1355_v16 = vrot.slane %v1327_v9, %v2102_v47  ;;  %v1356_v2 = vcombine.low %v1334_v10, %v1341_v11  ;;  %v1262_v17 = vrot.slane %v1010_v48, %v2090_v42  ;;  %v1266_v18 = vrot.slane %v1010_v48, %v2093_v43 }
  0xdc   : > { %v1568_v20 = vcombine.low %v1560_v6, %v1567_v13  ;;  %v1270_v21 = vrot.slane %v1010_v48, %v2096_v44  ;;  %v1274_v22 = vrot.slane %v1010_v48, %v2099_v45  ;;  %v1618_v23 = vcombine.low %v1246_v8, %v1250_v12 }
  0xdd   : > { %v1357_v24 = vcombine.low %v1348_v52, %v1355_v16  ;;  %v1364_v25 = vrot.slane %v1356_v2, %v2102_v47  ;;  %v1619_v26 = vcombine.low %v1254_v14, %v1258_v15  ;;  %v1620_v27 = vcombine.low %v1262_v17, %v1266_v18 }
  0xde   : > { %1683 = vperm.xlu0 %1987, %v1568_v20   ;;  %v1621_v29 = vcombine.low %v1270_v21, %v1274_v22  ;;  %v1628_v19 = vrot.slane %v1618_v23, %v2102_v47  ;;  %v436_v30 = vrot.slane %v229_v4, %v2078_v38  ;;  %v440_v31 = vrot.slane %v229_v4, %v2081_v39 }
  0xdf   : > { %v1371_v32 = vrot.slane %v1357_v24, %v2102_v47  ;;  %v1635_v34 = vrot.slane %v1619_v26, %v2102_v47  ;;  %v1642_v35 = vrot.slane %v1620_v27, %v2102_v47  ;;  %v444_v37 = vrot.slane %v229_v4, %v2084_v40 }
  0xe0   : > { %v1649_v46 = vrot.slane %v1621_v29, %v2102_v47  ;;  %v448_v49 = vrot.slane %v229_v4, %v2087_v41  ;;  %v452_v50 = vrot.slane %v229_v4, %v2090_v42  ;;  %v456_v51 = vrot.slane %v229_v4, %v2093_v43 }
  0xe1   : > { %v1372_v53 = vcombine.low %v1364_v25, %v1371_v32  ;;  %v1650_v54 = vcombine.low %v1628_v19, %v1635_v34  ;;  %v460_v48 = vrot.slane %v229_v4, %v2096_v44  ;;  %v464_v55 = vrot.slane %v229_v4, %v2099_v45  ;;  %v1007_v25 = vpop.xlane.xlu0 %1006 }
  0xe2   : > { %v1651_v56 = vcombine.low %v1642_v35, %v1649_v46  ;;  %v791_v57 = vcombine.low %v436_v30, %v440_v31  ;;  %v792_v58 = vcombine.low %v444_v37, %v448_v49  ;;  %v793_v59 = vcombine.low %v452_v50, %v456_v51 }
  0xe3   : > { %1671 = vperm.xlu1 %1988, %v1372_v53   ;;  %v1658_v60 = vrot.slane %v1650_v54, %v2102_v47  ;;  %v794_v61 = vcombine.low %v460_v48, %v464_v55  ;;  %v468_v62 = vrot.slane %v232_v28, %v2078_v38  ;;  %v472_v63 = vrot.slane %v232_v28, %v2081_v39 }
  0xe4   : > { %v1665_v1 = vrot.slane %v1651_v56, %v2102_v47  ;;  %v801_v3 = vrot.slane %v791_v57, %v2102_v47  ;;  %v808_v5 = vrot.slane %v792_v58, %v2102_v47  ;;  %v815_v4 = vrot.slane %v793_v59, %v2102_v47 }
  0xe5   : > { %v822_v6 = vrot.slane %v794_v61, %v2102_v47  ;;  %v476_v7 = vrot.slane %v232_v28, %v2084_v40  ;;  %v480_v8 = vrot.slane %v232_v28, %v2087_v41  ;;  %v484_v9 = vrot.slane %v232_v28, %v2090_v42 }
  0xe6   : > { %v1666_v10 = vcombine.low %v1658_v60, %v1665_v1  ;;  %v823_v11 = vcombine.low %v801_v3, %v808_v5  ;;  %v488_v12 = vrot.slane %v232_v28, %v2093_v43  ;;  %v492_v13 = vrot.slane %v232_v28, %v2096_v44 }
  0xe7   : > { %v824_v52 = vcombine.low %v815_v4, %v822_v6  ;;  %v496_v14 = vrot.slane %v232_v28, %v2099_v45  ;;  %v840_v15 = vcombine.low %v468_v62, %v472_v63  ;;  %v841_v16 = vcombine.low %v476_v7, %v480_v8 }
  0xe8   : > { %1689 = vperm.xlu0 %1987, %v1666_v10   ;;  %v831_v2 = vrot.slane %v823_v11, %v2102_v47  ;;  %v842_v17 = vcombine.low %v484_v9, %v488_v12  ;;  %v1150_v18 = vrot.slane %v1001_v0, %v2078_v38  ;;  %v1154_v20 = vrot.slane %v1001_v0, %v2081_v39 }
  0xe9   : > { %v838_v21 = vrot.slane %v824_v52, %v2102_v47  ;;  %v843_v22 = vcombine.low %v492_v13, %v496_v14  ;;  %v850_v23 = vrot.slane %v840_v15, %v2102_v47  ;;  %v857_v24 = vrot.slane %v841_v16, %v2102_v47 }
  0xea   : > { %v864_v26 = vrot.slane %v842_v17, %v2102_v47  ;;  %v1158_v27 = vrot.slane %v1001_v0, %v2084_v40  ;;  %v1162_v28 = vrot.slane %v1001_v0, %v2087_v41  ;;  %v1166_v29 = vrot.slane %v1001_v0, %v2090_v42 }
  0xeb   : > { %v839_v19 = vcombine.low %v831_v2, %v838_v21  ;;  %v871_v30 = vrot.slane %v843_v22, %v2102_v47  ;;  %v872_v31 = vcombine.low %v850_v23, %v857_v24  ;;  %v1170_v32 = vrot.slane %v1001_v0, %v2093_v43 }
  0xec   : > { %v1174_v34 = vrot.slane %v1001_v0, %v2096_v44  ;;  %v1178_v35 = vrot.slane %v1001_v0, %v2099_v45  ;;  %v1471_v37 = vcombine.low %v1150_v18, %v1154_v20  ;;  %v1472_v46 = vcombine.low %v1158_v27, %v1162_v28 }
  0xed   : > { %908 = vperm.xlu1 %1988, %v839_v19   ;;  %v873_v49 = vcombine.low %v864_v26, %v871_v30  ;;  %v880_v50 = vrot.slane %v872_v31, %v2102_v47  ;;  %v1473_v51 = vcombine.low %v1166_v29, %v1170_v32  ;;  %v1214_v53 = vrot.slane %v1007_v25, %v2078_v38 }
  0xee   : > { %v1474_v54 = vcombine.low %v1174_v34, %v1178_v35  ;;  %v1481_v48 = vrot.slane %v1471_v37, %v2102_v47  ;;  %v1488_v55 = vrot.slane %v1472_v46, %v2102_v47  ;;  %v1218_v56 = vrot.slane %v1007_v25, %v2081_v39 }
  0xef   : > { %v887_v57 = vrot.slane %v873_v49, %v2102_v47  ;;  %v1495_v58 = vrot.slane %v1473_v51, %v2102_v47  ;;  %v1222_v59 = vrot.slane %v1007_v25, %v2084_v40  ;;  %v1226_v60 = vrot.slane %v1007_v25, %v2087_v41 }
  0xf0   : > { %v1502_v61 = vrot.slane %v1474_v54, %v2102_v47  ;;  %v1503_v62 = vcombine.low %v1481_v48, %v1488_v55  ;;  %v1230_v63 = vrot.slane %v1007_v25, %v2090_v42  ;;  %v1234_v0 = vrot.slane %v1007_v25, %v2093_v43 }
  0xf1   : > { %v888_v1 = vcombine.low %v880_v50, %v887_v57  ;;  %v1238_v3 = vrot.slane %v1007_v25, %v2096_v44  ;;  %v1242_v39 = vrot.slane %v1007_v25, %v2099_v45  ;;  %v1569_v5 = vcombine.low %v1214_v53, %v1218_v56 }
  0xf2   : > { %v1504_v4 = vcombine.low %v1495_v58, %v1502_v61  ;;  %v1511_v6 = vrot.slane %v1503_v62, %v2102_v47  ;;  %v1570_v7 = vcombine.low %v1222_v59, %v1226_v60  ;;  %v1571_v40 = vcombine.low %v1230_v63, %v1234_v0 }
  0xf3   : > { %911 = vperm.xlu1 %1988, %v888_v1   ;;  %v1572_v41 = vcombine.low %v1238_v3, %v1242_v39  ;;  %v1579_v8 = vrot.slane %v1569_v5, %v2102_v47  ;;  %v2015_v14 = vmov 0.0   ;;  %v2016_v15 = vmov -inf  }
  0xf4   : > { %v1518_v9 = vrot.slane %v1504_v4, %v2102_v47  ;;  %v1586_v42 = vrot.slane %v1570_v7, %v2102_v47  ;;  %v1593_v43 = vrot.slane %v1571_v40, %v2102_v47  ;;  %190 = vst.msk [vmem:[#allocation2] sm:$0x1] %vm189_vm0, %v2015_v14  ;;  %191 = vst.msk [vmem:[#allocation3] sm:$0x1] %vm189_vm0, %v2016_v15  ;;  %v914_v22 = vand.u32 127, %v241_v33 }
  0xf5   : > { %v1600_v44 = vrot.slane %v1572_v41, %v2102_v47 }
  0xf6   : > { %v1519_v10 = vcombine.low %v1511_v6, %v1518_v9  ;;  %v1601_v45 = vcombine.low %v1579_v8, %v1586_v42  ;;  %v919_v23 = vadd.s32 4294967288, %v914_v22  ;;  %v926_v24 = vadd.s32 4294967280, %v914_v22 }
  0xf7   : > { %v1602_v11 = vcombine.low %v1593_v43, %v1600_v44  ;;  %v933_v26 = vadd.s32 4294967272, %v914_v22  ;;  %v940_v27 = vadd.s32 4294967264, %v914_v22  ;;  %v947_v19 = vadd.s32 4294967256, %v914_v22 }
  0xf8   : > { %1680 = vperm.xlu1 %1988, %v1519_v10   ;;  %v1609_v12 = vrot.slane %v1601_v45, %v2102_v47  ;;  %v922_v29 = vsub.s32 %v919_v23, %v2075_v36  ;;  %v929_v30 = vsub.s32 %v926_v24, %v2075_v36  ;;  %v954_v31 = vadd.s32 4294967248, %v914_v22 }
  0xf9   : > { %v1616_v13 = vrot.slane %v1602_v11, %v2102_v47  ;;  %v917_v32 = vsub.s32 %v914_v22, %v2075_v36  ;;  %v936_v34 = vsub.s32 %v933_v26, %v2075_v36  ;;  %v943_v37 = vsub.s32 %v940_v27, %v2075_v36 }
  0xfa   : > { %v950_v46 = vsub.s32 %v947_v19, %v2075_v36  ;;  %v957_v50 = vsub.s32 %v954_v31, %v2075_v36  ;;  %v961_v48 = vadd.s32 4294967240, %v914_v22 }
  0xfb   : > { %v1617_v52 = vcombine.low %v1609_v12, %v1616_v13  ;;  %v208_v42 = vld [vmem:[#allocation2] sm:$0x1] }
  0xfc   : > { %v964_v63 = vsub.s32 %v961_v48, %v2075_v36 }
  0xfd   : > { %1686 = vperm.xlu1 %1988, %v1617_v52  }
 0x12e   : > { %v891_v25 = vpop.permute.xlu0 %890 }
 0x12f   : > { %v918_v53 = vrot.slane %v891_v25, %v917_v32 }
 0x134   : > { %v894_v16 = vpop.permute.xlu1 %893 }
 0x135   : > { %v923_v33 = vrot.slane %v894_v16, %v922_v29 }
 0x137   : > { %v925_v56 = vsel %vm924_vm1, %v923_v33, %v918_v53 }
 0x138   : > { %v897_v2 = vpop.permute.xlu1 %896 }
 0x139   : > { %v930_v49 = vrot.slane %v897_v2, %v929_v30 }
 0x13b   : > { %v932_v59 = vsel %vm931_vm2, %v930_v49, %v925_v56 }
 0x13d   : > { %v900_v17 = vpop.permute.xlu1 %899 }
 0x13e   : > { %v937_v54 = vrot.slane %v900_v17, %v936_v34 }
 0x140   : > { %v939_v62 = vsel %vm938_vm3, %v937_v54, %v932_v59 }
 0x142   : > { %v903_v18 = vpop.permute.xlu1 %902 }
 0x143   : > { %v944_v55 = vrot.slane %v903_v18, %v943_v37 }
 0x145   : > { %v946_v0 = vsel %vm945_vm4, %v944_v55, %v939_v62 }
 0x148   : > { %v1675_v35 = vpop.permute.xlu0 %1674 }
 0x149   : > { %v1703_v39 = vrot.slane %v1675_v35, %v929_v30 }
 0x14d   : > { %v906_v20 = vpop.permute.xlu1 %905 }
 0x14e   : > { %v951_v57 = vrot.slane %v906_v20, %v950_v46 }
 0x150   : > { %v953_v5 = vsel %vm952_vm5, %v951_v57, %v946_v0 }
 0x152   : > { %v1678_v58 = vpop.permute.xlu0 %1677 }
 0x153   : > { %v1708_v8 = vrot.slane %v1678_v58, %v936_v34 }
 0x157   : > { %v1669_v21 = vpop.permute.xlu1 %1668 }
 0x158   : > { %v1694_v1 = vrot.slane %v1669_v21, %v917_v32  ;;  %v986_v21 = vld [vmem:[#allocation3] sm:$0x1] }
 0x15d   : > { %v1684_v40 = vpop.permute.xlu0 %1683 }
 0x15e   : > { %v1718_v52 = vrot.slane %v1684_v40, %v950_v46 }
 0x162   : > { %v1672_v28 = vpop.permute.xlu1 %1671 }
 0x163   : > { %v1698_v60 = vrot.slane %v1672_v28, %v922_v29 }
 0x165   : > { %v1699_v6 = vsel %vm924_vm1, %v1698_v60, %v1694_v1 }
 0x166   : > { %v1704_v9 = vsel %vm931_vm2, %v1703_v39, %v1699_v6 }
 0x167   : > { %v1709_v11 = vsel %vm938_vm3, %v1708_v8, %v1704_v9  ;;  %v1690_v12 = vpop.permute.xlu0 %1689 }
 0x168   : > { %v1728_v16 = vrot.slane %v1690_v12, %v964_v63 }
 0x16c   : > { %v909_v51 = vpop.permute.xlu1 %908 }
 0x16d   : > { %v958_v61 = vrot.slane %v909_v51, %v957_v50 }
 0x16f   : > { %v960_v7 = vsel %vm959_vm6, %v958_v61, %v953_v5 }
 0x172   : > { %v912_v3 = vpop.permute.xlu1 %911 }
 0x173   : > { %v965_v4 = vrot.slane %v912_v3, %v964_v63 }
 0x175   : > { %v967_v41 = vsel %vm966_vm7, %v965_v4, %v960_v7 }
 0x176   : > { %v974_v36 = vrot.slane %v967_v41, %v2102_v47 }
 0x177   : > { %v1681_v43 = vpop.permute.xlu1 %1680 }
 0x178   : > { %v981_v44 = vrot.slane %v974_v36, %v2102_v47  ;;  %v1713_v10 = vrot.slane %v1681_v43, %v943_v37 }
 0x17a   : > { %v983_v45 = vadd.f32 %v981_v44, %v208_v42  ;;  %v1714_v13 = vsel %vm945_vm4, %v1713_v10, %v1709_v11 }
 0x17b   : > { %v1719_v2 = vsel %vm952_vm5, %v1718_v52, %v1714_v13 }
 0x17c   : > { %985 = vst.msk [vmem:[#allocation2] sm:$0x1] %vm189_vm0, %v983_v45  ;;  %v1687_v14 = vpop.permute.xlu1 %1686 }
 0x17d   : > { %v1723_v15 = vrot.slane %v1687_v14, %v957_v50 }
 0x17f   : > { %v1724_v17 = vsel %vm959_vm6, %v1723_v15, %v1719_v2 }
 0x180   : > { %v1729_v18 = vsel %vm966_vm7, %v1728_v16, %v1724_v17 }
 0x181   : > { %v1736_v20 = vrot.slane %v1729_v18, %v2102_v47 }
 0x183   : > { %v1743_v22 = vrot.slane %v1736_v20, %v2102_v47  ;;  %v1750_v25 = vld [vmem:[#allocation2] sm:$0x1] }
 0x184   : > { %v1751_v26 = vmul.f32 0.00390625, %v1750_v25 }
 0x185   : > { %v1745_v23 = vmax.f32 %v986_v21, %v1743_v22 }
 0x186   : > { %v1755_v27 = vrot.slane %v1751_v26, %v2078_v38 }
 0x187   : > { %1746 = vst.msk [vmem:[#allocation3] sm:$0x1] %vm189_vm0, %v1745_v23 }
 0x18e   : > { %v1953_v24 = vld [vmem:[#allocation3] ss:$0 sm:$0xff] }
 0x18f   : > { %1806 = vbcast.lane.b32.xlu0 %v1953_v24, 264  ;;  %1802 = vbcast.lane.b32.xlu1 %v1953_v24, 256 }
 0x193   : > { %1814 = vbcast.lane.b32.xlu0 %v1953_v24, 280  ;;  %1810 = vbcast.lane.b32.xlu1 %v1953_v24, 272 }
 0x197   : > { %1822 = vbcast.lane.b32.xlu0 %v1953_v24, 296  ;;  %1818 = vbcast.lane.b32.xlu1 %v1953_v24, 288 }
 0x19b   : > { %1761 = vbcast.lane.b32.xlu0 %v1755_v27, 264  ;;  %1757 = vbcast.lane.b32.xlu1 %v1755_v27, 256 }
 0x19f   : > { %1769 = vbcast.lane.b32.xlu0 %v1755_v27, 280  ;;  %1765 = vbcast.lane.b32.xlu1 %v1755_v27, 272 }
 0x1a3   : > { %1777 = vbcast.lane.b32.xlu0 %v1755_v27, 296  ;;  %1773 = vbcast.lane.b32.xlu1 %v1755_v27, 288 }
 0x1a7   : > { %1785 = vbcast.lane.b32.xlu0 %v1755_v27, 312  ;;  %1781 = vbcast.lane.b32.xlu1 %v1755_v27, 304 }
 0x1ab   : > { %1830 = vbcast.lane.b32.xlu0 %v1953_v24, 312  ;;  %1826 = vbcast.lane.b32.xlu1 %v1953_v24, 304 }
 0x201   : > { %v1807_v38 = vpop.permute.xlu0 %1806  ;;  %v1803_v47 = vpop.permute.xlu1 %1802 }
 0x202   : > { %1833 = vst.msk [vmem:[%s2394_s20 + $0x8] sm:$0xff] %vm1787_vm8, %v1807_v38  ;;  %1832 = vst.msk [vmem:[%s2394_s20] sm:$0xff] %vm1787_vm8, %v1803_v47 }
 0x205   : > { %v1815_v28 = vpop.permute.xlu0 %1814  ;;  %v1811_v29 = vpop.permute.xlu1 %1810 }
 0x206   : > { %1835 = vst.msk [vmem:[%s2394_s20 + $0x18] sm:$0xff] %vm1787_vm8, %v1815_v28  ;;  %1834 = vst.msk [vmem:[%s2394_s20 + $0x10] sm:$0xff] %vm1787_vm8, %v1811_v29 }
 0x209   : > { %v1823_v19 = vpop.permute.xlu0 %1822  ;;  %v1819_v30 = vpop.permute.xlu1 %1818 }
 0x20a   : > { %1837 = vst.msk [vmem:[%s2394_s20 + $0x28] sm:$0xff] %vm1787_vm8, %v1823_v19  ;;  %1836 = vst.msk [vmem:[%s2394_s20 + $0x20] sm:$0xff] %vm1787_vm8, %v1819_v30 }
 0x20d   : > { %v1762_v31 = vpop.permute.xlu0 %1761  ;;  %v1758_v32 = vpop.permute.xlu1 %1757 }
 0x20e   : > { %1789 = vst.msk [vmem:[%s179_s23 + $0x8] sm:$0xff] %vm1787_vm8, %v1762_v31  ;;  %1788 = vst.msk [vmem:[%s179_s23] sm:$0xff] %vm1787_vm8, %v1758_v32 }
 0x211   : > { %v1770_v34 = vpop.permute.xlu0 %1769  ;;  %v1766_v35 = vpop.permute.xlu1 %1765 }
 0x212   : > { %1791 = vst.msk [vmem:[%s179_s23 + $0x18] sm:$0xff] %vm1787_vm8, %v1770_v34  ;;  %1790 = vst.msk [vmem:[%s179_s23 + $0x10] sm:$0xff] %vm1787_vm8, %v1766_v35 }
 0x215   : > { %v1778_v37 = vpop.permute.xlu0 %1777  ;;  %v1774_v33 = vpop.permute.xlu1 %1773 }
 0x216   : > { %1793 = vst.msk [vmem:[%s179_s23 + $0x28] sm:$0xff] %vm1787_vm8, %v1778_v37  ;;  %1792 = vst.msk [vmem:[%s179_s23 + $0x20] sm:$0xff] %vm1787_vm8, %v1774_v33 }
 0x219   : > { %v1786_v46 = vpop.permute.xlu0 %1785  ;;  %v1782_v49 = vpop.permute.xlu1 %1781 }
 0x21a   : > { %1795 = vst.msk [vmem:[%s179_s23 + $0x38] sm:$0xff] %vm1787_vm8, %v1786_v46  ;;  %1794 = vst.msk [vmem:[%s179_s23 + $0x30] sm:$0xff] %vm1787_vm8, %v1782_v49 }
 0x21d   : > { %v1831_v50 = vpop.permute.xlu0 %1830  ;;  %v1827_v51 = vpop.permute.xlu1 %1826 }
 0x21e   : > { %1839 = vst.msk [vmem:[%s2394_s20 + $0x38] sm:$0xff] %vm1787_vm8, %v1831_v50  ;;  %1838 = vst.msk [vmem:[%s2394_s20 + $0x30] sm:$0xff] %vm1787_vm8, %v1827_v51 }
 0x21f PF: > { %s13_s11 = sadd.s32 1, %s2011_s11   ;;  %s2435_s9 = smov %s2007_s10 }
 0x220   : > { %p10_p5 = scmp.ge.s32.totalorder %s13_s11, 4   ;;  %s2436_s10 = smov %s2438_s12 }
 0x222   :  { %12 = sbr.rel (!%p10_p5) target bundleno = 2 (0x2), region = 74 }

</bundles_post_ra>
